<compile_context>
chip_gen: v5e
topology: v5e:2x2
jax: 0.10.0
libtpu: 0.0.40
codegen_flags: <defaults>
</compile_context>

<pallas_src>
import jax
import jax.numpy as jnp
from jax.experimental import pallas as pl
from jax.experimental.pallas import tpu as pltpu


# --------------------------------------------------------------------------
# Pallas kernel: per-row interaction + 2-hidden-layer MLP head (BN folded).
# --------------------------------------------------------------------------
def qccdm_kernel(x_ref, w1_ref, b1_ref, w2_ref, b2_ref, w3_ref, b3_ref, out_ref):
    # x_ref : (3, TB, K) stacked [ Mas | Diff | e_disc*Q_pseudo ] gathered rows.
    mas = x_ref[0]                                            # (TB, K)
    diff = x_ref[1]
    edq = x_ref[2]
    x = (mas - diff) * edq                                    # (TB, K)

    # Linear + (folded BN) + Tanh, twice.
    h = jnp.dot(x, w1_ref[...], preferred_element_type=jnp.float32) + b1_ref[...]
    h = jnp.tanh(h)
    h = jnp.dot(h, w2_ref[...], preferred_element_type=jnp.float32) + b2_ref[...]
    h = jnp.tanh(h)

    # Final Linear(H2 -> 1) as (1,H2) x (TB,H2)^T so the result lands directly
    # in the lane-dense (1, TB) output layout (no masked width-1 store).
    o = jax.lax.dot_general(
        w3_ref[...], h, (((1,), (1,)), ((), ())),
        preferred_element_type=jnp.float32) + b3_ref[...]
    out_ref[...] = jax.nn.sigmoid(o)                          # (1, TB)


# --------------------------------------------------------------------------
# pallas_call wrapper: batch tiling + lane-dense output handling.
# --------------------------------------------------------------------------
def _mlp_forward(x_stack, w1, b1, w2, b2, w3r, b3, *, tile_b=1024):
    _, B, K = x_stack.shape
    H1 = w1.shape[1]
    H2 = w2.shape[1]

    if B <= tile_b:
        # Single tile: round up to a sublane multiple; block == full array dims.
        tb = max(8, -(-B // 8) * 8)
    else:
        # Multi-tile: tile must be a multiple of 128 so the (1, tb) lane-dense
        # output block satisfies the lane constraint.
        tb = tile_b
        assert tb % 128 == 0, "tile_b must be a multiple of 128 for multi-tile grids"

    Bp = -(-B // tb) * tb
    if Bp != B:
        x_stack = jnp.pad(x_stack, ((0, 0), (0, Bp - B), (0, 0)))

    grid = (Bp // tb,)

    def param(shape):
        return pl.BlockSpec(shape, lambda i: (0, 0))

    out = pl.pallas_call(
        qccdm_kernel,
        out_shape=jax.ShapeDtypeStruct((1, Bp), jnp.float32),
        grid=grid,
        in_specs=[
            pl.BlockSpec((3, tb, K), lambda i: (0, i, 0)),    # stacked row input
            param((K, H1)), param((1, H1)),                   # w1, b1 (BN folded)
            param((H1, H2)), param((1, H2)),                  # w2, b2 (BN folded)
            param((1, H2)), param((1, 1)),                    # w3 (as row), b3
        ],
        out_specs=pl.BlockSpec((1, tb), lambda i: (0, i)),
        compiler_params=pltpu.CompilerParams(
            dimension_semantics=("parallel",)),
    )(x_stack, w1, b1, w2, b2, w3r, b3)
    return out[0, :B]


# --------------------------------------------------------------------------
# Once-per-parameter-update glue (plain JAX): structural solve, per-entity
# sigmoids, Q augmentation, e_disc fold, BatchNorm(eval) folding.
# --------------------------------------------------------------------------
def fold_bn_into_linear(w, b, gamma, beta, mean, var, eps=1e-5):
    s = gamma / jnp.sqrt(var + eps)          # (1, H)
    return w * s, b * s + (beta - mean * s)


def qccdm_precompute(zm_emb, zd_emb, ed_emb, graph, g_mask, q_neural, q_mask,
                     w1, b1, bn1_gamma, bn1_beta, bn1_mean, bn1_var,
                     w2, b2, bn2_gamma, bn2_beta, bn2_mean, bn2_var,
                     w3, b3, eps=1e-5):
    K = zm_emb.shape[1]
    ident = jnp.eye(K, dtype=jnp.float32)
    ainv = jnp.linalg.inv(ident - graph * g_mask)

    # Per-entity tables (size << batch): sigmoid + structure matmul hoisted out
    # of the per-row hot path.
    mas_table = jax.nn.sigmoid(jax.nn.sigmoid(zm_emb) @ ainv)       # (S, K)
    diff_table = jax.nn.sigmoid(jax.nn.sigmoid(zd_emb) @ ainv)      # (P, K)
    q_pseudo = q_neural * (1.0 - q_mask) + q_mask                   # (P, K)
    edq_table = jax.nn.sigmoid(ed_emb) * q_pseudo                   # (P, K)

    w1f, b1f = fold_bn_into_linear(w1, b1, bn1_gamma, bn1_beta, bn1_mean, bn1_var, eps)
    w2f, b2f = fold_bn_into_linear(w2, b2, bn2_gamma, bn2_beta, bn2_mean, bn2_var, eps)
    w3r = w3.T                                                      # (1, H2)

    return (mas_table, diff_table, edq_table), (w1f, b1f, w2f, b2f, w3r, b3)


def qccdm_forward(stu_id, prob_id, tables, mlp_params, *, tile_b=1024):
    mas_table, diff_table, edq_table = tables
    # Embedding gathers (glue) + stacked (3, B, K) row stream for the kernel.
    x_stack = jnp.stack(
        [mas_table[stu_id], diff_table[prob_id], edq_table[prob_id]], axis=0)
    return _mlp_forward(x_stack, *mlp_params, tile_b=tile_b)


# --------------------------------------------------------------------------
# Pure-JAX reference of the PyTorch forward (eval-mode BN, dropout identity).
# --------------------------------------------------------------------------
def reference_forward(stu_id, prob_id, zm_emb, zd_emb, ed_emb, graph, g_mask,
                      q_neural, q_mask, w1, b1, w2, b2, w3, b3, eps=1e-5):
    K = zm_emb.shape[1]
    ainv = jnp.linalg.inv(jnp.eye(K, dtype=jnp.float32) - graph * g_mask)
    lzm = jax.nn.sigmoid(zm_emb[stu_id])
    lzd = jax.nn.sigmoid(zd_emb[prob_id])
    ed = jax.nn.sigmoid(ed_emb[prob_id])
    mas = jax.nn.sigmoid(lzm @ ainv)
    diff = jax.nn.sigmoid(lzd @ ainv)
    q_ps = (q_neural * (1.0 - q_mask) + q_mask)[prob_id]
    x = ed * (mas - diff) * q_ps
    s = 1.0 / jnp.sqrt(1.0 + eps)            # BN eval: mean=0, var=1, gamma=1, beta=0
    h = jnp.tanh((x @ w1 + b1) * s)
    h = jnp.tanh((h @ w2 + b2) * s)
    return jax.nn.sigmoid(h @ w3 + b3).reshape(-1)


def xavier_normal(key, shape):
    fan_in, fan_out = shape[0], shape[1]
    std = (2.0 / (fan_in + fan_out)) ** 0.5
    return std * jax.random.normal(key, shape, dtype=jnp.float32)


if __name__ == "__main__":
    STU_NUM, PROB_NUM, KNOW_NUM = 64, 32, 16
    HIDDEN = 32            # small stand-in for hidden_dim=512
    B = 8
    EPS = 1e-5

    key = jax.random.PRNGKey(0)
    keys = jax.random.split(key, 16)

    # ----- masks / Q-matrix (non-trainable buffers) -------------------------
    g_mask = jnp.triu(jnp.ones((KNOW_NUM, KNOW_NUM), jnp.float32), k=1)
    q_mask = jax.random.bernoulli(keys[0], 0.5, (PROB_NUM, KNOW_NUM)).astype(jnp.float32)

    # ----- structural parameters ('1' and '2' in mode) ----------------------
    graph = jax.nn.sigmoid(xavier_normal(keys[1], (KNOW_NUM, KNOW_NUM)))
    q_neural = jax.nn.sigmoid(xavier_normal(keys[2], (PROB_NUM, KNOW_NUM)))

    # ----- embeddings --------------------------------------------------------
    zm_emb = xavier_normal(keys[3], (STU_NUM, KNOW_NUM))
    zd_emb = xavier_normal(keys[4], (PROB_NUM, KNOW_NUM))
    ed_emb = xavier_normal(keys[5], (PROB_NUM, 1))

    # ----- MLP head parameters (stored as (in, out) for x @ W) --------------
    H1, H2 = HIDDEN, HIDDEN // 2
    w1 = xavier_normal(keys[6], (KNOW_NUM, H1))
    b1 = jax.random.uniform(keys[7], (1, H1), minval=-0.1, maxval=0.1)
    w2 = xavier_normal(keys[8], (H1, H2))
    b2 = jax.random.uniform(keys[9], (1, H2), minval=-0.1, maxval=0.1)
    w3 = xavier_normal(keys[10], (H2, 1))
    b3 = jax.random.uniform(keys[11], (1, 1), minval=-0.1, maxval=0.1)

    # BatchNorm1d eval-mode running stats of a fresh module.
    g1, z1 = jnp.ones((1, H1), jnp.float32), jnp.zeros((1, H1), jnp.float32)
    g2, z2 = jnp.ones((1, H2), jnp.float32), jnp.zeros((1, H2), jnp.float32)

    tables, mlp_params = qccdm_precompute(
        zm_emb, zd_emb, ed_emb, graph, g_mask, q_neural, q_mask,
        w1, b1, g1, z1, z1, g1,
        w2, b2, g2, z2, z2, g2,
        w3, b3, eps=EPS)

    # ----- batch of (stu_id, prob_id) ----------------------------------------
    stu_id = jax.random.randint(keys[12], (B,), 0, STU_NUM)
    prob_id = jax.random.randint(keys[13], (B,), 0, PROB_NUM)

    out = qccdm_forward(stu_id, prob_id, tables, mlp_params, tile_b=1024)
    out = jax.block_until_ready(out)

    ref = reference_forward(stu_id, prob_id, zm_emb, zd_emb, ed_emb, graph,
                            g_mask, q_neural, q_mask, w1, b1, w2, b2, w3, b3,
                            eps=EPS)

    assert out.shape == (B,)
    assert bool(jnp.all(jnp.isfinite(out)))
    assert bool(jnp.all((out > 0.0) & (out < 1.0)))
    # Loose tolerance: MXU default-precision f32 matmuls vs XLA reference.
    assert bool(jnp.max(jnp.abs(out - ref)) < 2e-2)
    print("KERNEL_OK")
</pallas_src>

<mosaic_0001>
module attributes {stable_mosaic.version = 11 : i64} {
  func.func @qccdm_kernel(%arg0: i32, %arg1: memref<3x8x16xf32, #tpu.memory_space<vmem>>, %arg2: memref<16x32xf32, #tpu.memory_space<vmem>>, %arg3: memref<1x32xf32, #tpu.memory_space<vmem>>, %arg4: memref<32x16xf32, #tpu.memory_space<vmem>>, %arg5: memref<1x16xf32, #tpu.memory_space<vmem>>, %arg6: memref<1x16xf32, #tpu.memory_space<vmem>>, %arg7: memref<1x1xf32, #tpu.memory_space<vmem>>, %arg8: memref<1x8xf32, #tpu.memory_space<vmem>>) attributes {dimension_semantics = [#tpu.dimension_semantics<parallel>], iteration_bounds = array<i64: 1>, scalar_prefetch = 0 : i64, scratch_operands = 0 : i64, tpu.core_type = #tpu.core_type<tc>, window_params = [{transform_indices = @transform_0, window_bounds = array<i64: 3, 8, 16>}, {pipeline_mode = #tpu.pipeline_mode<synchronous>, transform_indices = @transform_1, window_bounds = array<i64: 16, 32>}, {pipeline_mode = #tpu.pipeline_mode<synchronous>, transform_indices = @transform_2, window_bounds = array<i64: 1, 32>}, {pipeline_mode = #tpu.pipeline_mode<synchronous>, transform_indices = @transform_3, window_bounds = array<i64: 32, 16>}, {pipeline_mode = #tpu.pipeline_mode<synchronous>, transform_indices = @transform_4, window_bounds = array<i64: 1, 16>}, {pipeline_mode = #tpu.pipeline_mode<synchronous>, transform_indices = @transform_5, window_bounds = array<i64: 1, 16>}, {pipeline_mode = #tpu.pipeline_mode<synchronous>, transform_indices = @transform_6, window_bounds = array<i64: 1, 1>}, {transform_indices = @transform_7, window_bounds = array<i64: 1, 8>}]} {
    %c0 = arith.constant 0 : index
    %c0_0 = arith.constant 0 : index
    %c0_1 = arith.constant 0 : index
    %0 = vector.load %arg1[%c0, %c0_0, %c0_1] : memref<3x8x16xf32, #tpu.memory_space<vmem>>, vector<1x8x16xf32>
    %1 = vector.shape_cast %0 : vector<1x8x16xf32> to vector<8x16xf32>
    %c1 = arith.constant 1 : index
    %c0_2 = arith.constant 0 : index
    %c0_3 = arith.constant 0 : index
    %2 = vector.load %arg1[%c1, %c0_2, %c0_3] : memref<3x8x16xf32, #tpu.memory_space<vmem>>, vector<1x8x16xf32>
    %3 = vector.shape_cast %2 : vector<1x8x16xf32> to vector<8x16xf32>
    %c2 = arith.constant 2 : index
    %c0_4 = arith.constant 0 : index
    %c0_5 = arith.constant 0 : index
    %4 = vector.load %arg1[%c2, %c0_4, %c0_5] : memref<3x8x16xf32, #tpu.memory_space<vmem>>, vector<1x8x16xf32>
    %5 = vector.shape_cast %4 : vector<1x8x16xf32> to vector<8x16xf32>
    %6 = arith.subf %1, %3 : vector<8x16xf32>
    %7 = arith.mulf %6, %5 : vector<8x16xf32>
    %c0_6 = arith.constant 0 : index
    %c0_7 = arith.constant 0 : index
    %8 = vector.load %arg2[%c0_6, %c0_7] : memref<16x32xf32, #tpu.memory_space<vmem>>, vector<16x32xf32>
    %cst = arith.constant dense<0.000000e+00> : vector<8x32xf32>
    %9 = tpu.matmul %7, %8, %cst {dimension_numbers = #tpu.dot_dimension_numbers<[1], [0], [0], [1], [0, 0, 1, 1], [], []>} : vector<8x16xf32>, vector<16x32xf32>, vector<8x32xf32> -> vector<8x32xf32>
    %c0_8 = arith.constant 0 : index
    %c0_9 = arith.constant 0 : index
    %10 = vector.load %arg3[%c0_8, %c0_9] : memref<1x32xf32, #tpu.memory_space<vmem>>, vector<1x32xf32>
    %11 = vector.broadcast %10 : vector<1x32xf32> to vector<8x32xf32>
    %12 = arith.addf %9, %11 : vector<8x32xf32>
    %13 = math.tanh %12 : vector<8x32xf32>
    %c0_10 = arith.constant 0 : index
    %c0_11 = arith.constant 0 : index
    %14 = vector.load %arg4[%c0_10, %c0_11] : memref<32x16xf32, #tpu.memory_space<vmem>>, vector<32x16xf32>
    %cst_12 = arith.constant dense<0.000000e+00> : vector<8x16xf32>
    %15 = tpu.matmul %13, %14, %cst_12 {dimension_numbers = #tpu.dot_dimension_numbers<[1], [0], [0], [1], [0, 0, 1, 1], [], []>} : vector<8x32xf32>, vector<32x16xf32>, vector<8x16xf32> -> vector<8x16xf32>
    %c0_13 = arith.constant 0 : index
    %c0_14 = arith.constant 0 : index
    %16 = vector.load %arg5[%c0_13, %c0_14] : memref<1x16xf32, #tpu.memory_space<vmem>>, vector<1x16xf32>
    %17 = vector.broadcast %16 : vector<1x16xf32> to vector<8x16xf32>
    %18 = arith.addf %15, %17 : vector<8x16xf32>
    %19 = math.tanh %18 : vector<8x16xf32>
    %c0_15 = arith.constant 0 : index
    %c0_16 = arith.constant 0 : index
    %20 = vector.load %arg6[%c0_15, %c0_16] : memref<1x16xf32, #tpu.memory_space<vmem>>, vector<1x16xf32>
    %cst_17 = arith.constant dense<0.000000e+00> : vector<1x8xf32>
    %21 = tpu.matmul %20, %19, %cst_17 {dimension_numbers = #tpu.dot_dimension_numbers<[1], [1], [0], [0], [0, 0, 1, 0], [], []>} : vector<1x16xf32>, vector<8x16xf32>, vector<1x8xf32> -> vector<1x8xf32>
    %c0_18 = arith.constant 0 : index
    %c0_19 = arith.constant 0 : index
    %22 = vector.load %arg7[%c0_18, %c0_19] : memref<1x1xf32, #tpu.memory_space<vmem>>, vector<1x1xf32>
    %23 = vector.broadcast %22 : vector<1x1xf32> to vector<1x8xf32>
    %24 = arith.addf %21, %23 : vector<1x8xf32>
    %25 = arith.negf %24 : vector<1x8xf32>
    %26 = math.exp %25 : vector<1x8xf32>
    %cst_20 = arith.constant 1.000000e+00 : f32
    %27 = vector.broadcast %cst_20 : f32 to vector<1x8xf32>
    %28 = arith.addf %27, %26 : vector<1x8xf32>
    %29 = arith.divf %27, %28 : vector<1x8xf32>
    %c0_21 = arith.constant 0 : index
    %c0_22 = arith.constant 0 : index
    %30 = vector.load %arg8[%c0_21, %c0_22] : memref<1x8xf32, #tpu.memory_space<vmem>>, vector<1x8xf32>
    tpu.vector_store %arg8[%c0_21, %c0_22], %29 {strides = array<i32>} : memref<1x8xf32, #tpu.memory_space<vmem>>, vector<1x8xf32>,
    return
  }
  func.func @transform_0(%arg0: i32) -> (i32, i32, i32) {
    %c0_i32 = arith.constant 0 : i32
    %c0_i32_0 = arith.constant 0 : i32
    %c0_i32_1 = arith.constant 0 : i32
    return %c0_i32, %arg0, %c0_i32_0 : i32, i32, i32
  }
  func.func @transform_1(%arg0: i32) -> (i32, i32) {
    %c0_i32 = arith.constant 0 : i32
    %c0_i32_0 = arith.constant 0 : i32
    %c0_i32_1 = arith.constant 0 : i32
    return %c0_i32, %c0_i32_0 : i32, i32
  }
  func.func @transform_2(%arg0: i32) -> (i32, i32) {
    %c0_i32 = arith.constant 0 : i32
    %c0_i32_0 = arith.constant 0 : i32
    %c0_i32_1 = arith.constant 0 : i32
    return %c0_i32, %c0_i32_0 : i32, i32
  }
  func.func @transform_3(%arg0: i32) -> (i32, i32) {
    %c0_i32 = arith.constant 0 : i32
    %c0_i32_0 = arith.constant 0 : i32
    %c0_i32_1 = arith.constant 0 : i32
    return %c0_i32, %c0_i32_0 : i32, i32
  }
  func.func @transform_4(%arg0: i32) -> (i32, i32) {
    %c0_i32 = arith.constant 0 : i32
    %c0_i32_0 = arith.constant 0 : i32
    %c0_i32_1 = arith.constant 0 : i32
    return %c0_i32, %c0_i32_0 : i32, i32
  }
  func.func @transform_5(%arg0: i32) -> (i32, i32) {
    %c0_i32 = arith.constant 0 : i32
    %c0_i32_0 = arith.constant 0 : i32
    %c0_i32_1 = arith.constant 0 : i32
    return %c0_i32, %c0_i32_0 : i32, i32
  }
  func.func @transform_6(%arg0: i32) -> (i32, i32) {
    %c0_i32 = arith.constant 0 : i32
    %c0_i32_0 = arith.constant 0 : i32
    %c0_i32_1 = arith.constant 0 : i32
    return %c0_i32, %c0_i32_0 : i32, i32
  }
  func.func @transform_7(%arg0: i32) -> (i32, i32) {
    %c0_i32 = arith.constant 0 : i32
    %c0_i32_0 = arith.constant 0 : i32
    return %c0_i32, %arg0 : i32, i32
  }
}

</mosaic_0001>

<bundles_post_ra>
// kernel: tpu_custom_call.1
= control target key start
LH: loop header
LB: loop body
LE: loop exit
PB: predicated region body
PF: predicated region fallthrough
CT: control target
= control target key end

     0   :  { %s304_s0 = inlined_call_operand.vmem [shape: f32[3,8,16], index: 0, kind: input, shape index: {}]   ;;  %s305_s1 = inlined_call_operand.vmem [shape: f32[16,32], index: 1, kind: input, shape index: {}]   ;;  %s306_s2 = inlined_call_operand.vmem [shape: f32[1,32], index: 2, kind: input, shape index: {}]   ;;  %s307_s3 = inlined_call_operand.vmem [shape: f32[32,16], index: 3, kind: input, shape index: {}]   ;;  %s308_s4 = inlined_call_operand.vmem [shape: f32[1,16], index: 4, kind: input, shape index: {}]   ;;  %s309_s5 = inlined_call_operand.vmem [shape: f32[1,16], index: 5, kind: input, shape index: {}]   ;;  %s310_s6 = inlined_call_operand.<no memory space> [shape: f32[1,1], index: 6, kind: input, shape index: {}]   ;;  %s311_s7 = inlined_call_operand.hbm [shape: f32[1,8], index: 7, kind: output, shape index: {}]  }
   0x1   :  { %v12_v0 = vstv %s310_s6 }
   0x2   :  { %13 = vst [vmem:[#allocation2] sm:$0x1] %v12_v0 }
   0x3   :  { %v37_v1 = vld [vmem:[%s305_s1 + $0x8] sm:$0xff]  ;;  %v36_v2 = vld [vmem:[%s305_s1] sm:$0xff]  ;;  %v172_v5 = vld [vmem:[%s304_s0 + $0x10] sm:$0xff] }
   0x4   :  { %v29_v3 = vld [vmem:[%s304_s0] sm:$0xff]  ;;  %60 = vmatpush.msra.mxu0 %v37_v1  ;;  %v171_v4 = vld [vmem:[%s304_s0 + $0x8] sm:$0xff] }
   0x5   :  { %v34_v6 = vsub.f32 %v29_v3, %v171_v4 }
   0x6   :  { %14 = vsyncpa [#allocation4], 0  ;;  %61 = vmatpush.msra.mxu0 %v36_v2  ;;  %vm42_vm0 = vcmask 130048   ;;  %v70_v8 = vld [vmem:[%s307_s3 + $0x18] sm:$0xff]  ;;  %v69_v9 = vld [vmem:[%s307_s3 + $0x10] sm:$0xff]  ;;  %vm75_vm1 = vcmask 261120  }
   0x7   :  { %v35_v7 = vmul.f32 %v172_v5, %v34_v6  ;;  %91 = vmatpush.msra.mxu1 %v70_v8  ;;  %v68_v10 = vld [vmem:[%s307_s3 + $0x8] sm:$0xff]  ;;  %v67_v11 = vld [vmem:[%s307_s3] sm:$0xff]  ;;  %v217_v17 = vmov 0   ;;  %s162_s24 = sshll.u32 %s311_s7, 4  ;;  %vm153_vm5 = vcmask 57344   ;;  %s163_s24 = int_to_ptr.hbm [resolvable:$true] %s162_s24 }
   0x8   :  { %v181_v12 = vld [vmem:[%s306_s2] ss:$0 sm:$0xff]  ;;  %180 = vset.pattern.permute.xlu0 %v217_v17 }
   0x9   :  { %173 = vmatmul.msk.f32.vlgmr.msra.gmra.mxu0 %vm42_vm0, %v35_v7  ;;  %92 = vmatpush.msra.mxu1 %v69_v9  ;;  %v101_v16 = vld [vmem:[#allocation2] sm:$0x1] }
   0xa   :  { %104 = vperm.xlu0 %180, %v101_v16   ;;  %v182_v18 = vld [vmem:[%s308_s4] ss:$0 sm:$0xff]  ;;  %s218_s4 = smov [#allocation3]  }
   0xb   :  { %93 = vmatpush.msra.mxu1 %v68_v10  ;;  %v100_v22 = vld [vmem:[%s309_s5] sm:$0x1]  ;;  %s160_s5 = sshll.u32 %s218_s4, 4  ;;  %s161_s5 = int_to_ptr.vmem [resolvable:$true] %s160_s5 }
   0xd   :  { %94 = vmatpush.msra.mxu1 %v67_v11 }
  0x7c   :  { %v105_v23 = vpop.permute.xlu0 %104 }
  0x7d   :  { %v107_v24 = vperm.slane %v105_v23, 0 }
  0x86   :  { %v63_v13 = vpop.f32.mrf.mxu0 }
  0x87   :  { %v64_v14 = vadd.f32 %v181_v12, %v63_v13 }
  0x89   :  { %183 = vtanh.f32 %v64_v14 }
  0x8f   :  { %v184_v15 = vpop.eup %183 }
  0x90   :  { %174 = vmatmul.msk.f32.vlgmr.msra.gmra.mxu1 %vm75_vm1, %v184_v15 }
 0x10d   :  { %v96_v19 = vpop.f32.mrf.mxu1 }
 0x10e   :  { %v97_v20 = vadd.f32 %v182_v18, %v96_v19 }
 0x110   :  { %185 = vtanh.f32 %v97_v20 }
 0x116   :  { %v186_v21 = vpop.eup %185 }
 0x117   :  { %175 = vmatpush.xpose.msk.msra.mxu2 %vm42_vm0, %v186_v21 }
 0x11a   :  { %176 = vmatmul.msk.f32.vlgmr.msra.gmra.mxu2 %vm42_vm0, %v100_v22 }
 0x19d   :  { %v131_v25 = vpop.f32.mrf.mxu2 }
 0x19e   :  { %v132_v26 = vadd.f32 %v131_v25, %v107_v24 }
 0x1a0   :  { %v177_v27 = vmul.f32 -1.442695, %v132_v26 }
 0x1a2   :  { %187 = vpow2.f32 %v177_v27 }
 0x1a8   :  { %v188_v28 = vpop.eup %187 }
 0x1a9   :  { %v137_v29 = vadd.f32 1.0, %v188_v28 }
 0x1ab   :  { %189 = vrcp.f32 %v137_v29  ;;  %v149_v33 = vand.u32 2147483648, %v137_v29  ;;  %v147_v35 = vand.u32 2147483647, %v137_v29  ;;  %vm143_vm3 = vweird.f32 %v137_v29 }
 0x1ad   :  { %v150_v37 = vor.u32 1.1754944e-38, %v149_v33  ;;  %vm148_vm6 = vcmp.eq.f32.partialorder %v147_v35, 8.507059e+37 }
 0x1b1   :  { %v190_v30 = vpop.eup %189 }
 0x1b2   :  { %v139_v31 = vmul.f32 %v190_v30, %v137_v29  ;;  %vm144_vm2 = vweird.f32 %v190_v30 }
 0x1b3   :  { %vm145_vm4 = vmor %vm143_vm3, %vm144_vm2 }
 0x1b4   :  { %v140_v32 = vsub.f32 1.0, %v139_v31 }
 0x1b6   :  { %v141_v34 = vmul.f32 %v190_v30, %v140_v32 }
 0x1b8   :  { %v142_v36 = vadd.f32 %v190_v30, %v141_v34 }
 0x1ba   :  { %v146_v38 = vsel %vm145_vm4, %v190_v30, %v142_v36 }
 0x1bb   :  { %v151_v39 = vsel %vm148_vm6, %v150_v37, %v146_v38 }
 0x1bc   :  { %154 = vst.msk [vmem:[#allocation3] sm:$0x1] %vm153_vm5, %v151_v39 }
 0x1bd   :  { %165 = dma.vmem_to_hbm [thread:$0]  %s161_s5, 16, %s163_s24, [#allocation4]  }
 0x1be   :  { %215 = dma.done.wait [#allocation4], 16  }
 0x1bf   :  { %216 = vsyncadd [#allocation4], 4294967280 }
 0x1c0   :  { %170 = vsyncpa [#allocation4], 1 }

</bundles_post_ra>
